<compile_context>
chip_gen: v7x
topology: tpu7x:2x2x1
jax: 0.10.0
libtpu: 0.0.40
codegen_flags: <defaults>
</compile_context>

<pallas_src>
import functools
import math

import numpy as np

import jax
import jax.numpy as jnp
from jax.experimental import pallas as pl
from jax.experimental.pallas import tpu as pltpu


def _round_up(x, m):
    return ((x + m - 1) // m) * m


# ----------------------------------------------------------------------------
# Pallas kernel: one lane-tile of phrases (degrees packed side by side).
# ----------------------------------------------------------------------------
def _motion_batch_kernel(deg_ref, out_ref, *, kspecs, threshold, H, H_pad, W):
    """deg_ref : VMEM i32[1, BWt]   tile_b phrases' degree rows, side by side
       out_ref : VMEM f32[1, BWt]   phrase p's score lands at lane p*W
       kspecs  : tuple of (kh, kw, nonzero_taps, weight), baked at trace time."""
    deg = deg_ref[...]                                     # (1, BW) int32
    BW = deg.shape[-1]
    thr = jnp.float32(threshold)

    # Hoisted constants (built once per grid step).
    row_iota = jax.lax.broadcasted_iota(jnp.int32, (H_pad, BW), 0)
    col_local = jax.lax.broadcasted_iota(jnp.int32, (1, BW), 1) % W

    # --- trace-time caches ---------------------------------------------------
    deg_cache = {0: deg}                                   # b -> lane-rolled degrees

    def deg_shift(b):
        # left-shift by b lanes: out[0, j] = deg[0, j + b]  (cheap 1-row XLU roll)
        if b not in deg_cache:
            deg_cache[b] = pltpu.roll(deg, shift=BW - b, axis=1)
        return deg_cache[b]

    mask_cache = {}                                        # (kh, kw) -> valid positions

    def valid_mask(kh, kw):
        key = (kh, kw)
        if key not in mask_cache:
            # Valid "valid-conv" output positions: rows < H-kh+1 and, within each
            # phrase, cols < W-kw+1 (also kills lane-roll wrap across phrases).
            mask_cache[key] = jnp.logical_and(
                row_iota < (H - kh + 1), col_local < (W - kw + 1))
        return mask_cache[key]

    # --- per-kernel correlation; threshold+weight fused into ONE accumulator -
    score_acc = jnp.zeros((H_pad, BW), jnp.float32)
    for kh, kw, taps, weight in kspecs:
        if weight == 0.0:
            continue
        acc = jnp.zeros((H_pad, BW), jnp.float32)
        for a, b, v in taps:                               # only NONZERO taps
            # x[i+a, j+b] == 1  <=>  deg[j+b] - a == i   (vertical shift is free)
            hit = row_iota == (deg_shift(b) - a)           # (H_pad, BW) bool
            acc = jnp.where(hit, acc + jnp.float32(v), acc)
        hits = jnp.logical_and(acc >= thr, valid_mask(kh, kw))
        score_acc = jnp.where(hits, score_acc + jnp.float32(weight), score_acc)

    # --- single cross-sublane reduction (one XLU reduce for ALL kernels) ----
    score_row = jnp.sum(score_acc, axis=0, keepdims=True)  # (1, BW)

    # --- log-depth masked segmented lane reduction: fold each phrase's W lanes
    #     into its first lane (works for any W; no cross-phrase bleed). --------
    total = score_row
    covered = 1
    while covered < W:
        shifted = pltpu.roll(total, shift=BW - covered, axis=1)   # t[j+covered]
        total = total + jnp.where(col_local + covered < W, shifted, 0.0)
        covered *= 2

    out_ref[...] = total                                    # lane-dense store


# ----------------------------------------------------------------------------
# Wrapper glue
# ----------------------------------------------------------------------------
def _build_kernel_specs(motion_kernels, motion_weights):
    if motion_weights is None or len(motion_weights) != len(motion_kernels):
        motion_weights = [1.0 for _ in motion_kernels]       # torch fallback
    specs = []
    for k, wgt in zip(motion_kernels, motion_weights):
        ka = np.asarray(k, dtype=np.float32)
        if ka.ndim != 2:
            raise ValueError("motion kernels must be 2D")
        kh, kw = ka.shape
        taps = tuple((a, b, float(ka[a, b]))
                     for a in range(kh) for b in range(kw)
                     if float(ka[a, b]) != 0.0)
        specs.append((int(kh), int(kw), taps, float(wgt)))
    return tuple(specs)


def motion_analyzer_forward_batch(degrees, num_degrees, motion_kernels,
                                  motion_weights, threshold=2.0):
    """Batched MotionAnalyzer.forward.

    degrees     : int[B, W] (or int[W]) scale-degree sequences (one per phrase)
    num_degrees : number of scale degrees H (one-hot height)
    returns     : f32[B] per-phrase motion scores
    """
    deg = jnp.asarray(degrees, jnp.int32)
    if deg.ndim == 1:
        deg = deg[None]
    B, W = deg.shape
    H = int(num_degrees)

    kspecs = _build_kernel_specs(motion_kernels, motion_weights)
    for kh, kw, _, _ in kspecs:
        if kh > H or kw > W:
            raise ValueError(
                f"motion kernel ({kh}x{kw}) larger than phrase map ({H}x{W})")

    H_pad = max(8, _round_up(H, 8))                  # keep (8,128)-aligned maps

    # Large lane tile: ~2048 lanes (multiple of lcm(W, 128)) per grid step so
    # per-step overhead is amortized and the output store is unmasked.
    lane_lcm = W * 128 // math.gcd(W, 128)
    tile_bw = min(_round_up(2048, lane_lcm), _round_up(B * W, lane_lcm))
    tile_b = tile_bw // W
    b_pad = _round_up(B, tile_b)
    if b_pad != B:
        # Pad with degree -1 -> all-zero one-hot; padded scores are discarded.
        deg = jnp.concatenate(
            [deg, jnp.full((b_pad - B, W), -1, jnp.int32)], axis=0)

    deg_row = deg.reshape(1, b_pad * W)              # free reshape, no transpose
    grid = (b_pad // tile_b,)
    # NOTE(v7x): with very large batches the grid naturally has >= 2 steps and
    # "parallel" shards them across the 2 TensorCores; for tiny batches one
    # step on one TC is the right call on v5e/v6e anyway.

    kernel_fn = functools.partial(_motion_batch_kernel, kspecs=kspecs,
                                  threshold=float(threshold),
                                  H=H, H_pad=H_pad, W=W)

    out = pl.pallas_call(
        kernel_fn,
        out_shape=jax.ShapeDtypeStruct((1, b_pad * W), jnp.float32),
        grid=grid,
        in_specs=[pl.BlockSpec((1, tile_bw), lambda i: (0, i))],
        out_specs=pl.BlockSpec((1, tile_bw), lambda i: (0, i)),
        compiler_params=pltpu.CompilerParams(
            dimension_semantics=("parallel",)),
    )(deg_row)

    # phrase p's score sits at lane p*W of the output row
    scores = out[0].reshape(b_pad, W)[:, 0]
    return scores[:B]


def motion_analyzer_forward(degree_phrase, num_degrees, motion_kernels,
                            motion_weights, threshold=2.0):
    """Original single-phrase semantics: scalar score for one degree sequence."""
    scores = motion_analyzer_forward_batch(
        jnp.asarray(degree_phrase, jnp.int32)[None], num_degrees,
        motion_kernels, motion_weights, threshold)
    return scores[0]


# ----------------------------------------------------------------------------
# Utility (deg_to_char equivalent) — for callers / reference only; the kernel
# builds the one-hot internally from the degrees.
# ----------------------------------------------------------------------------
def deg_to_onehot(degrees, num_degrees):
    degrees = jnp.asarray(degrees, jnp.int32)
    eye = jnp.arange(num_degrees, dtype=jnp.int32)
    return (degrees[..., None, :] == eye[:, None]).astype(jnp.float32)


# ----------------------------------------------------------------------------
# Pure-numpy reference (correctness check only)
# ----------------------------------------------------------------------------
def _reference_scores(degrees, num_degrees, motion_kernels, motion_weights,
                      threshold):
    if motion_weights is None or len(motion_weights) != len(motion_kernels):
        motion_weights = [1.0 for _ in motion_kernels]
    degrees = np.asarray(degrees)
    H = int(num_degrees)
    out = []
    for drow in degrees:
        W = drow.shape[0]
        x = (np.arange(H)[:, None] == drow[None, :]).astype(np.float32)
        running = 0.0
        for k, wgt in zip(motion_kernels, motion_weights):
            ka = np.asarray(k, np.float32)
            kh, kw = ka.shape
            Ho, Wo = H - kh + 1, W - kw + 1
            acc = np.zeros((Ho, Wo), np.float32)
            for a in range(kh):
                for b in range(kw):
                    acc += x[a:a + Ho, b:b + Wo] * float(ka[a, b])
            running += float(wgt) * float(np.sum(acc >= threshold))
        out.append(running)
    return np.asarray(out, np.float32)


if __name__ == "__main__":
    key = jax.random.PRNGKey(0)

    # Synthetic batch of "PermutationPhrase"s: 16 phrases, 16 steps over 12
    # scale degrees.  Phrase 0 is a deterministic ascending run so the motion
    # kernels definitely activate.
    num_degrees, phrase_len, batch = 12, 16, 16
    degrees = jax.random.randint(key, (batch, phrase_len), 0, num_degrees)
    degrees = degrees.at[0].set(
        jnp.arange(phrase_len, dtype=jnp.int32) % num_degrees)

    # Fixed motion-pattern kernels (stored verbatim into Conv2d weights in the
    # torch module); different shapes are supported.
    motion_kernels = [
        np.array([[1.0, 0.0, 0.0],
                  [0.0, 1.0, 0.0],
                  [0.0, 0.0, 1.0]], np.float32),   # ascending step motion
        np.array([[0.0, 0.0, 1.0],
                  [0.0, 1.0, 0.0],
                  [1.0, 0.0, 0.0]], np.float32),   # descending step motion
        np.array([[1.0, 1.0],
                  [1.0, 1.0]], np.float32),        # cluster / repeat motion
    ]
    motion_weights = [1.0, 0.5, 2.0]
    threshold = 2.0

    scores = motion_analyzer_forward_batch(
        degrees, num_degrees, motion_kernels, motion_weights, threshold)
    scores = jax.block_until_ready(scores)

    ref = _reference_scores(degrees, num_degrees, motion_kernels,
                            motion_weights, threshold)
    assert np.allclose(np.asarray(scores), ref, atol=1e-4), (
        np.asarray(scores), ref)

    # Original single-phrase semantics (scalar), via the same batched kernel.
    s0 = motion_analyzer_forward(degrees[0], num_degrees, motion_kernels,
                                 motion_weights, threshold)
    s0 = jax.block_until_ready(s0)
    assert abs(float(s0) - float(ref[0])) < 1e-4, (float(s0), float(ref[0]))

    print("KERNEL_OK")
</pallas_src>

<mosaic_0001>
module attributes {stable_mosaic.version = 11 : i64} {
  func.func @_motion_batch_kernel(%arg0: i32, %arg1: memref<1x256xi32, #tpu.memory_space<vmem>>, %arg2: memref<1x256xf32, #tpu.memory_space<vmem>>) attributes {dimension_semantics = [#tpu.dimension_semantics<parallel>], iteration_bounds = array<i64: 1>, scalar_prefetch = 0 : i64, scratch_operands = 0 : i64, tpu.core_type = #tpu.core_type<tc>, window_params = [{transform_indices = @transform_0, window_bounds = array<i64: 1, 256>}, {transform_indices = @transform_1, window_bounds = array<i64: 1, 256>}]} {
    %c0 = arith.constant 0 : index
    %c0_0 = arith.constant 0 : index
    %0 = vector.load %arg1[%c0, %c0_0] : memref<1x256xi32, #tpu.memory_space<vmem>>, vector<1x256xi32>
    %1 = tpu.iota {dimensions = array<i32: 0>} : vector<16x256xi32>
    %2 = tpu.iota {dimensions = array<i32: 1>} : vector<1x256xi32>
    %c16_i32 = arith.constant 16 : i32
    %c0_i32 = arith.constant 0 : i32
    %3 = arith.cmpi eq, %c16_i32, %c0_i32 : i32
    %c1_i32 = arith.constant 1 : i32
    %4 = arith.select %3, %c1_i32, %c16_i32 : i32
    %5 = vector.broadcast %4 : i32 to vector<1x256xi32>
    %6 = arith.remsi %2, %5 : vector<1x256xi32>
    %c0_i32_1 = arith.constant 0 : i32
    %7 = vector.broadcast %c0_i32_1 : i32 to vector<1x256xi32>
    %8 = arith.cmpi ne, %6, %7 : vector<1x256xi32>
    %c0_i32_2 = arith.constant 0 : i32
    %9 = vector.broadcast %c0_i32_2 : i32 to vector<1x256xi32>
    %10 = arith.cmpi slt, %6, %9 : vector<1x256xi32>
    %c0_i32_3 = arith.constant 0 : i32
    %11 = arith.cmpi slt, %4, %c0_i32_3 : i32
    %12 = vector.broadcast %11 : i1 to vector<1x256xi1>
    %13 = vector.broadcast %12 : vector<1x256xi1> to vector<1x256xi1>
    %14 = arith.xori %10, %13 : vector<1x256xi1>
    %15 = arith.andi %14, %8 : vector<1x256xi1>
    %16 = vector.broadcast %4 : i32 to vector<1x256xi32>
    %17 = arith.addi %6, %16 : vector<1x256xi32>
    %18 = arith.select %15, %17, %6 : vector<1x256xi1>, vector<1x256xi32>
    %cst = arith.constant 0.000000e+00 : f32
    %19 = vector.broadcast %cst : f32 to vector<16x256xf32>
    %cst_4 = arith.constant 0.000000e+00 : f32
    %20 = vector.broadcast %cst_4 : f32 to vector<16x256xf32>
    %c0_i32_5 = arith.constant 0 : i32
    %21 = vector.broadcast %c0_i32_5 : i32 to vector<1x256xi32>
    %22 = arith.subi %0, %21 : vector<1x256xi32>
    %23 = vector.broadcast %22 : vector<1x256xi32> to vector<16x256xi32>
    %24 = arith.cmpi eq, %1, %23 : vector<16x256xi32>
    %cst_6 = arith.constant 1.000000e+00 : f32
    %25 = vector.broadcast %cst_6 : f32 to vector<16x256xf32>
    %26 = arith.addf %20, %25 : vector<16x256xf32>
    %27 = arith.select %24, %26, %20 : vector<16x256xi1>, vector<16x256xf32>
    %c255_i32 = arith.constant 255 : i32
    %28 = tpu.dynamic_rotate %0 by %c255_i32 dim 1 : vector<1x256xi32>, i32 -> vector<1x256xi32>
    %c1_i32_7 = arith.constant 1 : i32
    %29 = vector.broadcast %c1_i32_7 : i32 to vector<1x256xi32>
    %30 = arith.subi %28, %29 : vector<1x256xi32>
    %31 = vector.broadcast %30 : vector<1x256xi32> to vector<16x256xi32>
    %32 = arith.cmpi eq, %1, %31 : vector<16x256xi32>
    %cst_8 = arith.constant 1.000000e+00 : f32
    %33 = vector.broadcast %cst_8 : f32 to vector<16x256xf32>
    %34 = arith.addf %27, %33 : vector<16x256xf32>
    %35 = arith.select %32, %34, %27 : vector<16x256xi1>, vector<16x256xf32>
    %c254_i32 = arith.constant 254 : i32
    %36 = tpu.dynamic_rotate %0 by %c254_i32 dim 1 : vector<1x256xi32>, i32 -> vector<1x256xi32>
    %c2_i32 = arith.constant 2 : i32
    %37 = vector.broadcast %c2_i32 : i32 to vector<1x256xi32>
    %38 = arith.subi %36, %37 : vector<1x256xi32>
    %39 = vector.broadcast %38 : vector<1x256xi32> to vector<16x256xi32>
    %40 = arith.cmpi eq, %1, %39 : vector<16x256xi32>
    %cst_9 = arith.constant 1.000000e+00 : f32
    %41 = vector.broadcast %cst_9 : f32 to vector<16x256xf32>
    %42 = arith.addf %35, %41 : vector<16x256xf32>
    %43 = arith.select %40, %42, %35 : vector<16x256xi1>, vector<16x256xf32>
    %cst_10 = arith.constant 2.000000e+00 : f32
    %44 = vector.broadcast %cst_10 : f32 to vector<16x256xf32>
    %45 = arith.cmpf oge, %43, %44 : vector<16x256xf32>
    %c10_i32 = arith.constant 10 : i32
    %46 = vector.broadcast %c10_i32 : i32 to vector<16x256xi32>
    %47 = arith.cmpi slt, %1, %46 : vector<16x256xi32>
    %c14_i32 = arith.constant 14 : i32
    %48 = vector.broadcast %c14_i32 : i32 to vector<1x256xi32>
    %49 = arith.cmpi slt, %18, %48 : vector<1x256xi32>
    %50 = vector.broadcast %49 : vector<1x256xi1> to vector<16x256xi1>
    %51 = arith.andi %47, %50 : vector<16x256xi1>
    %52 = arith.andi %45, %51 : vector<16x256xi1>
    %cst_11 = arith.constant 1.000000e+00 : f32
    %53 = vector.broadcast %cst_11 : f32 to vector<16x256xf32>
    %54 = arith.addf %19, %53 : vector<16x256xf32>
    %55 = arith.select %52, %54, %19 : vector<16x256xi1>, vector<16x256xf32>
    %cst_12 = arith.constant 0.000000e+00 : f32
    %56 = vector.broadcast %cst_12 : f32 to vector<16x256xf32>
    %c0_i32_13 = arith.constant 0 : i32
    %57 = vector.broadcast %c0_i32_13 : i32 to vector<1x256xi32>
    %58 = arith.subi %36, %57 : vector<1x256xi32>
    %59 = vector.broadcast %58 : vector<1x256xi32> to vector<16x256xi32>
    %60 = arith.cmpi eq, %1, %59 : vector<16x256xi32>
    %cst_14 = arith.constant 1.000000e+00 : f32
    %61 = vector.broadcast %cst_14 : f32 to vector<16x256xf32>
    %62 = arith.addf %56, %61 : vector<16x256xf32>
    %63 = arith.select %60, %62, %56 : vector<16x256xi1>, vector<16x256xf32>
    %c1_i32_15 = arith.constant 1 : i32
    %64 = vector.broadcast %c1_i32_15 : i32 to vector<1x256xi32>
    %65 = arith.subi %28, %64 : vector<1x256xi32>
    %66 = vector.broadcast %65 : vector<1x256xi32> to vector<16x256xi32>
    %67 = arith.cmpi eq, %1, %66 : vector<16x256xi32>
    %cst_16 = arith.constant 1.000000e+00 : f32
    %68 = vector.broadcast %cst_16 : f32 to vector<16x256xf32>
    %69 = arith.addf %63, %68 : vector<16x256xf32>
    %70 = arith.select %67, %69, %63 : vector<16x256xi1>, vector<16x256xf32>
    %c2_i32_17 = arith.constant 2 : i32
    %71 = vector.broadcast %c2_i32_17 : i32 to vector<1x256xi32>
    %72 = arith.subi %0, %71 : vector<1x256xi32>
    %73 = vector.broadcast %72 : vector<1x256xi32> to vector<16x256xi32>
    %74 = arith.cmpi eq, %1, %73 : vector<16x256xi32>
    %cst_18 = arith.constant 1.000000e+00 : f32
    %75 = vector.broadcast %cst_18 : f32 to vector<16x256xf32>
    %76 = arith.addf %70, %75 : vector<16x256xf32>
    %77 = arith.select %74, %76, %70 : vector<16x256xi1>, vector<16x256xf32>
    %cst_19 = arith.constant 2.000000e+00 : f32
    %78 = vector.broadcast %cst_19 : f32 to vector<16x256xf32>
    %79 = arith.cmpf oge, %77, %78 : vector<16x256xf32>
    %80 = arith.andi %79, %51 : vector<16x256xi1>
    %cst_20 = arith.constant 5.000000e-01 : f32
    %81 = vector.broadcast %cst_20 : f32 to vector<16x256xf32>
    %82 = arith.addf %55, %81 : vector<16x256xf32>
    %83 = arith.select %80, %82, %55 : vector<16x256xi1>, vector<16x256xf32>
    %cst_21 = arith.constant 0.000000e+00 : f32
    %84 = vector.broadcast %cst_21 : f32 to vector<16x256xf32>
    %c0_i32_22 = arith.constant 0 : i32
    %85 = vector.broadcast %c0_i32_22 : i32 to vector<1x256xi32>
    %86 = arith.subi %0, %85 : vector<1x256xi32>
    %87 = vector.broadcast %86 : vector<1x256xi32> to vector<16x256xi32>
    %88 = arith.cmpi eq, %1, %87 : vector<16x256xi32>
    %cst_23 = arith.constant 1.000000e+00 : f32
    %89 = vector.broadcast %cst_23 : f32 to vector<16x256xf32>
    %90 = arith.addf %84, %89 : vector<16x256xf32>
    %91 = arith.select %88, %90, %84 : vector<16x256xi1>, vector<16x256xf32>
    %c0_i32_24 = arith.constant 0 : i32
    %92 = vector.broadcast %c0_i32_24 : i32 to vector<1x256xi32>
    %93 = arith.subi %28, %92 : vector<1x256xi32>
    %94 = vector.broadcast %93 : vector<1x256xi32> to vector<16x256xi32>
    %95 = arith.cmpi eq, %1, %94 : vector<16x256xi32>
    %cst_25 = arith.constant 1.000000e+00 : f32
    %96 = vector.broadcast %cst_25 : f32 to vector<16x256xf32>
    %97 = arith.addf %91, %96 : vector<16x256xf32>
    %98 = arith.select %95, %97, %91 : vector<16x256xi1>, vector<16x256xf32>
    %c1_i32_26 = arith.constant 1 : i32
    %99 = vector.broadcast %c1_i32_26 : i32 to vector<1x256xi32>
    %100 = arith.subi %0, %99 : vector<1x256xi32>
    %101 = vector.broadcast %100 : vector<1x256xi32> to vector<16x256xi32>
    %102 = arith.cmpi eq, %1, %101 : vector<16x256xi32>
    %cst_27 = arith.constant 1.000000e+00 : f32
    %103 = vector.broadcast %cst_27 : f32 to vector<16x256xf32>
    %104 = arith.addf %98, %103 : vector<16x256xf32>
    %105 = arith.select %102, %104, %98 : vector<16x256xi1>, vector<16x256xf32>
    %c1_i32_28 = arith.constant 1 : i32
    %106 = vector.broadcast %c1_i32_28 : i32 to vector<1x256xi32>
    %107 = arith.subi %28, %106 : vector<1x256xi32>
    %108 = vector.broadcast %107 : vector<1x256xi32> to vector<16x256xi32>
    %109 = arith.cmpi eq, %1, %108 : vector<16x256xi32>
    %cst_29 = arith.constant 1.000000e+00 : f32
    %110 = vector.broadcast %cst_29 : f32 to vector<16x256xf32>
    %111 = arith.addf %105, %110 : vector<16x256xf32>
    %112 = arith.select %109, %111, %105 : vector<16x256xi1>, vector<16x256xf32>
    %cst_30 = arith.constant 2.000000e+00 : f32
    %113 = vector.broadcast %cst_30 : f32 to vector<16x256xf32>
    %114 = arith.cmpf oge, %112, %113 : vector<16x256xf32>
    %c11_i32 = arith.constant 11 : i32
    %115 = vector.broadcast %c11_i32 : i32 to vector<16x256xi32>
    %116 = arith.cmpi slt, %1, %115 : vector<16x256xi32>
    %c15_i32 = arith.constant 15 : i32
    %117 = vector.broadcast %c15_i32 : i32 to vector<1x256xi32>
    %118 = arith.cmpi slt, %18, %117 : vector<1x256xi32>
    %119 = vector.broadcast %118 : vector<1x256xi1> to vector<16x256xi1>
    %120 = arith.andi %116, %119 : vector<16x256xi1>
    %121 = arith.andi %114, %120 : vector<16x256xi1>
    %cst_31 = arith.constant 2.000000e+00 : f32
    %122 = vector.broadcast %cst_31 : f32 to vector<16x256xf32>
    %123 = arith.addf %83, %122 : vector<16x256xf32>
    %124 = arith.select %121, %123, %83 : vector<16x256xi1>, vector<16x256xf32>
    %cst_32 = arith.constant dense<0.000000e+00> : vector<256xf32>
    %125 = vector.multi_reduction <add>, %124, %cst_32 [0] : vector<16x256xf32> to vector<256xf32>
    %126 = vector.shape_cast %125 : vector<256xf32> to vector<1x256xf32>
    %c255_i32_33 = arith.constant 255 : i32
    %127 = tpu.dynamic_rotate %126 by %c255_i32_33 dim 1 : vector<1x256xf32>, i32 -> vector<1x256xf32>
    %c1_i32_34 = arith.constant 1 : i32
    %128 = vector.broadcast %c1_i32_34 : i32 to vector<1x256xi32>
    %129 = arith.addi %18, %128 : vector<1x256xi32>
    %c16_i32_35 = arith.constant 16 : i32
    %130 = vector.broadcast %c16_i32_35 : i32 to vector<1x256xi32>
    %131 = arith.cmpi slt, %129, %130 : vector<1x256xi32>
    %cst_36 = arith.constant 0.000000e+00 : f32
    %132 = vector.broadcast %cst_36 : f32 to vector<1x256xf32>
    %133 = arith.select %131, %127, %132 : vector<1x256xi1>, vector<1x256xf32>
    %134 = arith.addf %126, %133 : vector<1x256xf32>
    %c254_i32_37 = arith.constant 254 : i32
    %135 = tpu.dynamic_rotate %134 by %c254_i32_37 dim 1 : vector<1x256xf32>, i32 -> vector<1x256xf32>
    %c2_i32_38 = arith.constant 2 : i32
    %136 = vector.broadcast %c2_i32_38 : i32 to vector<1x256xi32>
    %137 = arith.addi %18, %136 : vector<1x256xi32>
    %c16_i32_39 = arith.constant 16 : i32
    %138 = vector.broadcast %c16_i32_39 : i32 to vector<1x256xi32>
    %139 = arith.cmpi slt, %137, %138 : vector<1x256xi32>
    %cst_40 = arith.constant 0.000000e+00 : f32
    %140 = vector.broadcast %cst_40 : f32 to vector<1x256xf32>
    %141 = arith.select %139, %135, %140 : vector<1x256xi1>, vector<1x256xf32>
    %142 = arith.addf %134, %141 : vector<1x256xf32>
    %c252_i32 = arith.constant 252 : i32
    %143 = tpu.dynamic_rotate %142 by %c252_i32 dim 1 : vector<1x256xf32>, i32 -> vector<1x256xf32>
    %c4_i32 = arith.constant 4 : i32
    %144 = vector.broadcast %c4_i32 : i32 to vector<1x256xi32>
    %145 = arith.addi %18, %144 : vector<1x256xi32>
    %c16_i32_41 = arith.constant 16 : i32
    %146 = vector.broadcast %c16_i32_41 : i32 to vector<1x256xi32>
    %147 = arith.cmpi slt, %145, %146 : vector<1x256xi32>
    %cst_42 = arith.constant 0.000000e+00 : f32
    %148 = vector.broadcast %cst_42 : f32 to vector<1x256xf32>
    %149 = arith.select %147, %143, %148 : vector<1x256xi1>, vector<1x256xf32>
    %150 = arith.addf %142, %149 : vector<1x256xf32>
    %c248_i32 = arith.constant 248 : i32
    %151 = tpu.dynamic_rotate %150 by %c248_i32 dim 1 : vector<1x256xf32>, i32 -> vector<1x256xf32>
    %c8_i32 = arith.constant 8 : i32
    %152 = vector.broadcast %c8_i32 : i32 to vector<1x256xi32>
    %153 = arith.addi %18, %152 : vector<1x256xi32>
    %c16_i32_43 = arith.constant 16 : i32
    %154 = vector.broadcast %c16_i32_43 : i32 to vector<1x256xi32>
    %155 = arith.cmpi slt, %153, %154 : vector<1x256xi32>
    %cst_44 = arith.constant 0.000000e+00 : f32
    %156 = vector.broadcast %cst_44 : f32 to vector<1x256xf32>
    %157 = arith.select %155, %151, %156 : vector<1x256xi1>, vector<1x256xf32>
    %158 = arith.addf %150, %157 : vector<1x256xf32>
    %c0_45 = arith.constant 0 : index
    %c0_46 = arith.constant 0 : index
    %159 = vector.load %arg2[%c0_45, %c0_46] : memref<1x256xf32, #tpu.memory_space<vmem>>, vector<1x256xf32>
    tpu.vector_store %arg2[%c0_45, %c0_46], %158 {strides = array<i32>} : memref<1x256xf32, #tpu.memory_space<vmem>>, vector<1x256xf32>,
    return
  }
  func.func @transform_0(%arg0: i32) -> (i32, i32) {
    %c0_i32 = arith.constant 0 : i32
    %c0_i32_0 = arith.constant 0 : i32
    return %c0_i32, %arg0 : i32, i32
  }
  func.func @transform_1(%arg0: i32) -> (i32, i32) {
    %c0_i32 = arith.constant 0 : i32
    %c0_i32_0 = arith.constant 0 : i32
    return %c0_i32, %arg0 : i32, i32
  }
}

</mosaic_0001>

<bundles_post_ra>
// kernel: tpu_custom_call.1
= control target key start
LH: loop header
LB: loop body
LE: loop exit
PB: predicated region body
PF: predicated region fallthrough
CT: control target
= control target key end

     0   :  { %6 = vsyncpa [#allocation3], 0  ;;  %s808_s0 = inlined_call_operand.hbm [shape: s32[1,256], index: 0, kind: input, shape index: {}]   ;;  %s809_s1 = inlined_call_operand.hbm [shape: f32[1,256], index: 1, kind: output, shape index: {}]  }
   0x1   :  { %7 = vsyncpa [#allocation4], 0  ;;  %s456_s6 = smov [#allocation2]   ;;  %s408_s10 = scalar_lea.hbm %s808_s0, 32 }
   0x2   :  { %s14_s7 = sshll.u32 %s456_s6, 4  ;;  %p409_p0 = scmp.ne.s32.totalorder %s808_s0, %s408_s10  ;;  %s15_s7 = int_to_ptr.vmem [resolvable:$true] %s14_s7 }
   0x3   :  { %p412_p1 = scmp.lt.u32.totalorder %s408_s10, %s808_s0 }
   0x5   :  { %p414_p2 = pnand %p412_p1, %p409_p0 }
   0x7   :  { %417 = shalt.err (!%p414_p2)
}
   0x8   :  { %s418_s15 = scalar_lea.vmem %s15_s7, 32  ;;  %p423_p4 = scmp.lt.s32.totalorder %s15_s7, %s15_s7 }
   0x9   :  { %p419_p3 = scmp.ne.s32.totalorder %s15_s7, %s418_s15  ;;  %p424_p5 = scmp.lt.s32.totalorder %s418_s15, %s418_s15 }
   0xb   :  { %p425_p6 = por %p424_p5, %p423_p4 }
   0xd   :  { %p426_p7 = pnand %p425_p6, %p419_p3 }
   0xf   :  { %429 = shalt.err (!%p426_p7)
}
  0x10   :  { %17 = dma.hbm_to_vmem [thread:$0]  %s808_s0, 32, %s15_s7, [#allocation3]  }
  0x11   :  { %452 = dma.done.wait [#allocation3], 32  }
  0x12   :  { %453 = vsyncadd [#allocation3], 4294967264  ;;  %v22_v0 = vlaneseq  ;;  %v21_v4 = vld [vmem:[#allocation2] sm:$0x3]  ;;  %s457_s18 = smov 126   ;;  %s458_s19 = smov 127  }
  0x13   :  { %v398_v6 = vadd.s32 4294967294, %v21_v4  ;;  %v399_v8 = vadd.s32 4294967295, %v21_v4  ;;  %v459_v16 = vmov 0.0   ;;  %s460_s0 = smov 124   ;;  %s461_s20 = smov 120  }
  0x14   :  { %v487_v1 = vshrl.u32 %v22_v0, 7  ;;  %v506_v12 = vand.u32 127, %v22_v0  ;;  %s463_s21 = smov [#allocation5]  }
  0x15   :  { %s385_s22 = sshll.u32 %s463_s21, 4  ;;  %s386_s22 = int_to_ptr.vmem [resolvable:$true] %s385_s22 }
  0x16   :  { %v490_v2 = vsub.s32 0, %v487_v1  ;;  %v58_v3 = vsub.s32 1, %v487_v1  ;;  %v503_v11 = vadd.s32 8, %v487_v1  ;;  %v27_v13 = vadd.s32 128, %v506_v12  ;;  %s430_s23 = scalar_lea.vmem %s386_s22, 32  ;;  %p435_p9 = scmp.lt.s32.totalorder %s386_s22, %s386_s22 }
  0x17   :  { %vm810_vm4 = vcmp.lt.s32.totalorder %v506_v12, 126  ;;  %vm811_vm5 = vcmp.lt.s32.totalorder %v506_v12, 127  ;;  %v525_v20 = vand.u32 15, %v506_v12  ;;  %p431_p8 = scmp.ne.s32.totalorder %s386_s22, %s430_s23  ;;  %p436_p10 = scmp.lt.s32.totalorder %s430_s23, %s430_s23 }
  0x18   :  { %v55_v5 = vrot.slane %v21_v4, %v490_v2  ;;  %v59_v7 = vrot.slane %v21_v4, %v58_v3  ;;  %v496_v9 = vrot.slane %v398_v6, %v58_v3  ;;  %v500_v10 = vrot.slane %v399_v8, %v58_v3 }
  0x19   :  { %v527_v21 = vand.u32 15, %v27_v13  ;;  %v533_v23 = vrot.slane %v398_v6, %v490_v2  ;;  %v539_v26 = vrot.slane %v399_v8, %v490_v2  ;;  %vm131_vm6 = vcmp.lt.s32.totalorder %v503_v11, 10  ;;  %p437_p11 = por %p436_p10, %p435_p9 }
  0x1a   :  { %97 = vrot.lane.b32.xlu1 %v55_v5, %s457_s18  ;;  %68 = vrot.lane.b32.xlu0 %v55_v5, %s458_s19  ;;  %vm61_vm0 = vcmp.eq.s32.totalorder %v487_v1, %v59_v7  ;;  %vm63_vm1 = vcmp.eq.s32.totalorder %v503_v11, %v59_v7  ;;  %vm60_vm2 = vcmp.eq.s32.totalorder %v487_v1, %v55_v5  ;;  %vm132_vm7 = vcmp.lt.s32.totalorder %v525_v20, 14 }
  0x1b   :  { %v513_v17 = vsel %vm61_vm0, 1.0, %v459_v16  ;;  %v516_v18 = vsel %vm63_vm1, 1.0, %v459_v16  ;;  %vm62_vm3 = vcmp.eq.s32.totalorder %v503_v11, %v55_v5  ;;  %v520_v19 = vsel %vm60_vm2, 1.0, %v459_v16  ;;  %p438_p12 = pnand %p437_p11, %p431_p8 }
  0x1c   :  { %v530_v22 = vadd.f32 1.0, %v513_v17  ;;  %v536_v25 = vadd.f32 1.0, %v516_v18  ;;  %v542_v28 = vsel %vm62_vm3, 1.0, %v459_v16  ;;  %v545_v29 = vadd.f32 1.0, %v520_v19 }
  0x1d   :  { %vm133_vm10 = vcmp.lt.s32.totalorder %v527_v21, 14  ;;  %v91_v46 = vadd.f32 1.0, %v542_v28  ;;  %vm236_vm2 = vcmp.eq.s32.totalorder %v487_v1, %v539_v26  ;;  %vm237_vm1 = vcmp.eq.s32.totalorder %v487_v1, %v500_v10 }
  0x1e   :  { %99 = vrot.lane.b32.xlu1 %v59_v7, %s457_s18  ;;  %70 = vrot.lane.b32.xlu0 %v59_v7, %s458_s19 }
  0x8c   :  { %v98_v14 = vpop.permute.xlu1 %97  ;;  %v69_v15 = vpop.permute.xlu0 %68 }
  0x90   :  { %v100_v24 = vpop.permute.xlu1 %99  ;;  %v71_v27 = vpop.permute.xlu0 %70 }
  0x91   :  { %v102_v30 = vsel %vm810_vm4, %v98_v14, %v100_v24  ;;  %v103_v31 = vsel %vm810_vm4, %v100_v24, %v98_v14  ;;  %v73_v32 = vsel %vm811_vm5, %v69_v15, %v71_v27  ;;  %v74_v33 = vsel %vm811_vm5, %v71_v27, %v69_v15 }
  0x92   :  { %v396_v34 = vadd.s32 4294967294, %v102_v30  ;;  %v397_v35 = vadd.s32 4294967294, %v103_v31  ;;  %v153_v36 = vrot.slane %v102_v30, %v490_v2  ;;  %v157_v37 = vrot.slane %v103_v31, %v490_v2 }
  0x93   :  { %v394_v38 = vadd.s32 4294967295, %v73_v32  ;;  %v395_v39 = vadd.s32 4294967295, %v74_v33  ;;  %v560_v40 = vrot.slane %v73_v32, %v490_v2  ;;  %v563_v41 = vrot.slane %v74_v33, %v490_v2 }
  0x94   :  { %v109_v42 = vrot.slane %v396_v34, %v490_v2  ;;  %v113_v43 = vrot.slane %v397_v35, %v490_v2  ;;  %vm158_vm8 = vcmp.eq.s32.totalorder %v487_v1, %v153_v36  ;;  %vm159_vm9 = vcmp.eq.s32.totalorder %v487_v1, %v157_v37 }
  0x95   :  { %vm160_vm11 = vcmp.eq.s32.totalorder %v503_v11, %v153_v36  ;;  %vm161_vm12 = vcmp.eq.s32.totalorder %v503_v11, %v157_v37  ;;  %v162_v44 = vsel %vm158_vm8, 1.0, %v459_v16  ;;  %v163_v45 = vsel %vm159_vm9, 1.0, %v459_v16 }
  0x96   :  { %vm114_vm13 = vcmp.eq.s32.totalorder %v487_v1, %v109_v42  ;;  %vm115_vm14 = vcmp.eq.s32.totalorder %v487_v1, %v113_v43  ;;  %vm116_vm15 = vcmp.eq.s32.totalorder %v503_v11, %v109_v42  ;;  %vm117_vm0 = vcmp.eq.s32.totalorder %v503_v11, %v113_v43 }
  0x97   :  { %v164_v47 = vsel %vm160_vm11, 1.0, %v459_v16  ;;  %v165_v48 = vsel %vm161_vm12, 1.0, %v459_v16  ;;  %v166_v49 = vadd.f32 1.0, %v162_v44  ;;  %v167_v50 = vadd.f32 1.0, %v163_v45  ;;  %vm654_vm11 = vmand %vm131_vm6, %vm132_vm7 }
  0x98   :  { %v168_v51 = vadd.f32 1.0, %v164_v47  ;;  %v590_v52 = vrot.slane %v394_v38, %v490_v2  ;;  %v593_v53 = vrot.slane %v395_v39, %v490_v2  ;;  %v169_v54 = vadd.f32 1.0, %v165_v48 }
  0x99   :  { %vm219_vm9 = vcmp.eq.s32.totalorder %v487_v1, %v560_v40 }
  0x9a   :  { %vm815_vm4 = vcmp.eq.s32.totalorder %v487_v1, %v590_v52  ;;  %vm814_vm5 = vcmp.eq.s32.totalorder %v487_v1, %v593_v53  ;;  %vm813_vm8 = vcmp.eq.s32.totalorder %v503_v11, %v590_v52  ;;  %vm812_vm3 = vcmp.eq.s32.totalorder %v503_v11, %v593_v53 }
  0x9b   :  { %v93_v55 = vsel %vm815_vm4, %v545_v29, %v520_v19  ;;  %v94_v56 = vsel %vm814_vm5, %v530_v22, %v513_v17  ;;  %v95_v57 = vsel %vm813_vm8, %v91_v46, %v542_v28  ;;  %v96_v58 = vsel %vm812_vm3, %v536_v25, %v516_v18 }
  0x9c   :  { %v118_v59 = vadd.f32 1.0, %v93_v55  ;;  %v119_v60 = vadd.f32 1.0, %v94_v56  ;;  %v120_v61 = vadd.f32 1.0, %v95_v57  ;;  %v121_v62 = vadd.f32 1.0, %v96_v58 }
  0x9d   :  { %v170_v63 = vsel %vm815_vm4, %v166_v49, %v162_v44  ;;  %v171_v2 = vsel %vm814_vm5, %v167_v50, %v163_v45  ;;  %v172_v3 = vsel %vm813_vm8, %v168_v51, %v164_v47  ;;  %v173_v4 = vsel %vm812_vm3, %v169_v54, %v165_v48  ;;  %vm670_vm3 = vmand %vm131_vm6, %vm133_vm10 }
  0x9e   :  { %v122_v6 = vsel %vm114_vm13, %v118_v59, %v93_v55  ;;  %v123_v7 = vsel %vm115_vm14, %v119_v60, %v94_v56  ;;  %v124_v8 = vsel %vm116_vm15, %v120_v61, %v95_v57  ;;  %v125_v13 = vsel %vm117_vm0, %v121_v62, %v96_v58 }
  0x9f   :  { %vm126_vm8 = vcmp.ge.f32.partialorder %v122_v6, 2.0  ;;  %vm127_vm5 = vcmp.ge.f32.partialorder %v123_v7, 2.0  ;;  %vm128_vm13 = vcmp.ge.f32.partialorder %v124_v8, 2.0  ;;  %vm129_vm4 = vcmp.ge.f32.partialorder %v125_v13, 2.0 }
  0xa0   :  { %vm142_vm15 = vmand %vm126_vm8, %vm132_vm7  ;;  %v187_v15 = vadd.f32 1.0, %v170_v63  ;;  %v188_v24 = vadd.f32 1.0, %v171_v2  ;;  %v189_v27 = vadd.f32 1.0, %v172_v3  ;;  %v190_v30 = vadd.f32 1.0, %v173_v4 }
  0xa1   :  { %vm143_vm6 = vmand %vm127_vm5, %vm133_vm10  ;;  %v146_v31 = vsel %vm142_vm15, 1.0, %v459_v16  ;;  %v223_v32 = vsel %vm219_vm9, %v545_v29, %v520_v19  ;;  %vm820_vm0 = vcmp.eq.s32.totalorder %v487_v1, %v563_v41  ;;  %vm821_vm8 = vcmp.eq.s32.totalorder %v503_v11, %v560_v40 }
  0xa2   :  { %v224_v33 = vsel %vm820_vm0, %v530_v22, %v513_v17  ;;  %v225_v34 = vsel %vm821_vm8, %v91_v46, %v542_v28  ;;  %vm144_vm5 = vmand %vm128_vm13, %vm654_vm11  ;;  %v147_v35 = vsel %vm143_vm6, 1.0, %v459_v16  ;;  %vm822_vm15 = vcmp.eq.s32.totalorder %v487_v1, %v533_v23 }
  0xa3   :  { %v191_v19 = vsel %vm822_vm15, %v187_v15, %v170_v63  ;;  %vm823_vm9 = vcmp.eq.s32.totalorder %v487_v1, %v496_v9  ;;  %vm824_vm0 = vcmp.eq.s32.totalorder %v503_v11, %v533_v23  ;;  %vm145_vm8 = vmand %vm129_vm4, %vm670_vm3  ;;  %v148_v22 = vsel %vm144_vm5, 1.0, %v459_v16 }
  0xa4   :  { %v192_v29 = vsel %vm823_vm9, %v188_v24, %v171_v2  ;;  %v193_v17 = vsel %vm824_vm0, %v189_v27, %v172_v3  ;;  %vm825_vm13 = vcmp.eq.s32.totalorder %v503_v11, %v496_v9  ;;  %vm195_vm6 = vcmp.ge.f32.partialorder %v191_v19, 2.0 }
  0xa5   :  { %v194_v28 = vsel %vm825_vm13, %v190_v30, %v173_v4  ;;  %vm196_vm15 = vcmp.ge.f32.partialorder %v192_v29, 2.0  ;;  %v149_v36 = vsel %vm145_vm8, 1.0, %v459_v16  ;;  %vm197_vm14 = vcmp.ge.f32.partialorder %v193_v17, 2.0  ;;  %vm199_vm12 = vmand %vm195_vm6, %vm132_vm7 }
  0xa6   :  { %vm198_vm9 = vcmp.ge.f32.partialorder %v194_v28, 2.0  ;;  %v203_v23 = vadd.f32 0.5, %v146_v31  ;;  %vm200_vm0 = vmand %vm196_vm15, %vm133_vm10  ;;  %v204_v37 = vadd.f32 0.5, %v147_v35  ;;  %v205_v38 = vadd.f32 0.5, %v148_v22 }
  0xa7   :  { %v206_v39 = vadd.f32 0.5, %v149_v36  ;;  %vm826_vm4 = vcmp.eq.s32.totalorder %v503_v11, %v563_v41  ;;  %vm201_vm5 = vmand %vm197_vm14, %vm654_vm11  ;;  %v240_v16 = vadd.f32 1.0, %v223_v32  ;;  %v241_v40 = vadd.f32 1.0, %v224_v33 }
  0xa8   :  { %v226_v9 = vsel %vm826_vm4, %v536_v25, %v516_v18  ;;  %v242_v42 = vadd.f32 1.0, %v225_v34  ;;  %vm263_vm7 = vcmp.lt.s32.totalorder %v527_v21, 15  ;;  %v208_v44 = vsel %vm200_vm0, %v204_v37, %v147_v35 }
  0xa9   :  { %v243_v43 = vadd.f32 1.0, %v226_v9  ;;  %v207_v45 = vsel %vm199_vm12, %v203_v23, %v146_v31  ;;  %v209_v46 = vsel %vm201_vm5, %v205_v38, %v148_v22  ;;  %v244_v47 = vsel %vm236_vm2, %v240_v16, %v223_v32  ;;  %vm202_vm12 = vmand %vm198_vm9, %vm670_vm3 }
  0xaa   :  { %v245_v18 = vsel %vm237_vm1, %v241_v40, %v224_v33  ;;  %vm827_vm10 = vcmp.eq.s32.totalorder %v503_v11, %v539_v26  ;;  %vm828_vm11 = vcmp.eq.s32.totalorder %v503_v11, %v500_v10  ;;  %v248_v48 = vadd.f32 1.0, %v244_v47 }
  0xab   :  { %v246_v25 = vsel %vm827_vm10, %v242_v42, %v225_v34  ;;  %v247_v41 = vsel %vm828_vm11, %v243_v43, %v226_v9  ;;  %v249_v49 = vadd.f32 1.0, %v245_v18  ;;  %v210_v54 = vsel %vm202_vm12, %v206_v39, %v149_v36 }
  0xac   :  { %v250_v50 = vadd.f32 1.0, %v246_v25  ;;  %v251_v51 = vadd.f32 1.0, %v247_v41  ;;  %v277_v55 = vadd.f32 2.0, %v208_v44  ;;  %v276_v56 = vadd.f32 2.0, %v207_v45 }
  0xad   :  { %vm829_vm1 = vcmp.lt.s32.totalorder %v525_v20, 15  ;;  %vm830_vm2 = vcmp.lt.s32.totalorder %v503_v11, 11  ;;  %vm833_vm8 = vcmp.eq.s32.totalorder %v487_v1, %v590_v52  ;;  %vm834_vm3 = vcmp.eq.s32.totalorder %v487_v1, %v593_v53 }
  0xae   :  { %vm746_vm14 = vmand %vm830_vm2, %vm829_vm1  ;;  %v252_v10 = vsel %vm833_vm8, %v248_v48, %v244_v47  ;;  %v253_v57 = vsel %vm834_vm3, %v249_v49, %v245_v18  ;;  %vm835_vm13 = vcmp.eq.s32.totalorder %v503_v11, %v590_v52  ;;  %vm836_vm6 = vcmp.eq.s32.totalorder %v503_v11, %v593_v53 }
  0xaf   :  { %v254_v58 = vsel %vm835_vm13, %v250_v50, %v246_v25  ;;  %v255_v59 = vsel %vm836_vm6, %v251_v51, %v247_v41  ;;  %vm837_vm15 = vmmov %vm830_vm2  ;;  %vm256_vm0 = vcmp.ge.f32.partialorder %v252_v10, 2.0  ;;  %vm257_vm4 = vcmp.ge.f32.partialorder %v253_v57, 2.0 }
  0xb0   :  { %vm271_vm9 = vmand %vm837_vm15, %vm263_vm7  ;;  %vm258_vm5 = vcmp.ge.f32.partialorder %v254_v58, 2.0  ;;  %v278_v60 = vadd.f32 2.0, %v209_v46  ;;  %vm259_vm10 = vcmp.ge.f32.partialorder %v255_v59, 2.0  ;;  %v279_v61 = vadd.f32 2.0, %v210_v54 }
  0xb1   :  { %vm838_vm11 = vmmov %vm829_vm1  ;;  %v304_v31 = vadd.s32 1, %v525_v20  ;;  %v305_v32 = vadd.s32 1, %v527_v21  ;;  %vm839_vm3 = vcmp.lt.s32.totalorder %v506_v12, 127  ;;  %v318_v36 = vadd.s32 2, %v525_v20 }
  0xb2   :  { %vm272_vm12 = vmand %vm256_vm0, %vm838_vm11  ;;  %v319_v23 = vadd.s32 2, %v527_v21  ;;  %v348_v51 = vadd.s32 8, %v525_v20  ;;  %vm345_vm11 = vcmp.lt.s32.totalorder %v506_v12, 120 }
  0xb3   :  { %vm273_vm1 = vmand %vm257_vm4, %vm263_vm7  ;;  %v280_v52 = vsel %vm272_vm12, %v276_v56, %v207_v45  ;;  %vm306_vm7 = vcmp.lt.s32.totalorder %v304_v31, 16  ;;  %vm320_vm6 = vcmp.lt.s32.totalorder %v318_v36, 16  ;;  %v334_v45 = vadd.s32 4, %v527_v21 }
  0xb4   :  { %vm274_vm2 = vmand %vm258_vm5, %vm746_vm14  ;;  %v281_v53 = vsel %vm273_vm1, %v277_v55, %v208_v44  ;;  %vm307_vm14 = vcmp.lt.s32.totalorder %v305_v32, 16  ;;  %vm321_vm15 = vcmp.lt.s32.totalorder %v319_v23, 16  ;;  %v333_v44 = vadd.s32 4, %v525_v20 }
  0xb5   :  { %vm275_vm8 = vmand %vm259_vm10, %vm271_vm9  ;;  %v282_v11 = vsel %vm274_vm2, %v278_v60, %v209_v46  ;;  %vm841_vm9 = vcmp.lt.s32.totalorder %v506_v12, 126  ;;  %vm330_vm4 = vcmp.lt.s32.totalorder %v506_v12, 124  ;;  %vm336_vm10 = vcmp.lt.s32.totalorder %v334_v45, 16 }
  0xb6   :  { %v283_v62 = vsel %vm275_vm8, %v279_v61, %v210_v54  ;;  %v284_v63 = vadd.f32 %v282_v11, %v280_v52  ;;  %vm840_vm13 = vmmov %vm839_vm3  ;;  %vm335_vm5 = vcmp.lt.s32.totalorder %v333_v44, 16  ;;  %v349_v54 = vadd.s32 8, %v527_v21 }
  0xb7   :  { %v291_v2 = vadd.f32 %v283_v62, %v281_v53  ;;  %vm842_vm0 = vmmov %vm841_vm9  ;;  %v462_v55 = vmov 1966171168   ;;  %vm350_vm12 = vcmp.lt.s32.totalorder %v348_v51, 16  ;;  %vm376_vm2 = vcmp.lt.s32.totalorder %v22_v0, 256 }
  0xb8   :  { %v285_v3 = vrot.slane %v284_v63, 4  ;;  %v360_v56 = vunpack.c.l.s4 %v462_v55  ;;  %vm351_vm1 = vcmp.lt.s32.totalorder %v349_v54, 16 }
  0xb9   :  { %v292_v4 = vrot.slane %v291_v2, 4 }
  0xba   :  { %v286_v5 = vadd.f32 %v285_v3, %v284_v63  ;;  %v361_v26 = vunpack.c.0.s8 %v360_v56 }
  0xbb   :  { %v293_v6 = vadd.f32 %v292_v4, %v291_v2 }
  0xbc   :  { %v287_v7 = vrot.slane %v286_v5, 2  ;;  %v364_v52 = vsub.s32 %v361_v26, %v487_v1 }
  0xbd   :  { %v294_v8 = vrot.slane %v293_v6, 2 }
  0xbe   :  { %v288_v13 = vadd.f32 %v287_v7, %v286_v5 }
  0xbf   :  { %v295_v14 = vadd.f32 %v294_v8, %v293_v6 }
  0xc0   :  { %v289_v15 = vrot.slane %v288_v13, 1 }
  0xc1   :  { %v296_v24 = vrot.slane %v295_v14, 1 }
  0xc2   :  { %v290_v27 = vadd.f32 %v289_v15, %v288_v13 }
  0xc3   :  { %v297_v30 = vadd.f32 %v296_v24, %v295_v14 }
  0xc4   :  { %298 = vrot.lane.b32.xlu0 %v290_v27, %s458_s19 }
  0xc5   :  { %300 = vrot.lane.b32.xlu1 %v297_v30, %s458_s19 }
 0x136   :  { %v299_v33 = vpop.permute.xlu0 %298 }
 0x137   :  { %v301_v34 = vpop.permute.xlu1 %300 }
 0x138   :  { %v302_v35 = vsel %vm839_vm3, %v299_v33, %v301_v34  ;;  %v303_v19 = vsel %vm840_vm13, %v301_v34, %v299_v33 }
 0x139   :  { %v308_v29 = vsel %vm306_vm7, %v302_v35, 0.0  ;;  %v309_v17 = vsel %vm307_vm14, %v303_v19, 0.0 }
 0x13a   :  { %v310_v22 = vadd.f32 %v308_v29, %v290_v27  ;;  %v311_v28 = vadd.f32 %v309_v17, %v297_v30 }
 0x13c   :  { %314 = vrot.lane.b32.xlu1 %v311_v28, %s457_s18  ;;  %312 = vrot.lane.b32.xlu0 %v310_v22, %s457_s18 }
 0x1ae   :  { %v315_v37 = vpop.permute.xlu1 %314  ;;  %v313_v38 = vpop.permute.xlu0 %312 }
 0x1af   :  { %v316_v39 = vsel %vm841_vm9, %v313_v38, %v315_v37  ;;  %v317_v9 = vsel %vm842_vm0, %v315_v37, %v313_v38 }
 0x1b0   :  { %v322_v16 = vsel %vm320_vm6, %v316_v39, 0.0  ;;  %v323_v40 = vsel %vm321_vm15, %v317_v9, 0.0 }
 0x1b1   :  { %v324_v42 = vadd.f32 %v322_v16, %v310_v22  ;;  %v325_v43 = vadd.f32 %v323_v40, %v311_v28 }
 0x1b3   :  { %328 = vrot.lane.b32.xlu1 %v325_v43, %s460_s0  ;;  %326 = vrot.lane.b32.xlu0 %v324_v42, %s460_s0 }
 0x225   :  { %v329_v46 = vpop.permute.xlu1 %328  ;;  %v327_v47 = vpop.permute.xlu0 %326 }
 0x226   :  { %v331_v18 = vsel %vm330_vm4, %v327_v47, %v329_v46  ;;  %v332_v25 = vsel %vm330_vm4, %v329_v46, %v327_v47 }
 0x227   :  { %v337_v41 = vsel %vm335_vm5, %v331_v18, 0.0  ;;  %v338_v48 = vsel %vm336_vm10, %v332_v25, 0.0 }
 0x228   :  { %v339_v49 = vadd.f32 %v337_v41, %v324_v42  ;;  %v340_v50 = vadd.f32 %v338_v48, %v325_v43 }
 0x22a   :  { %343 = vrot.lane.b32.xlu1 %v340_v50, %s461_s20  ;;  %341 = vrot.lane.b32.xlu0 %v339_v49, %s461_s20 }
 0x29c   :  { %v344_v10 = vpop.permute.xlu1 %343  ;;  %v342_v57 = vpop.permute.xlu0 %341 }
 0x29d   :  { %v346_v58 = vsel %vm345_vm11, %v342_v57, %v344_v10  ;;  %v347_v59 = vsel %vm345_vm11, %v344_v10, %v342_v57 }
 0x29e   :  { %v352_v60 = vsel %vm350_vm12, %v346_v58, 0.0  ;;  %v353_v61 = vsel %vm351_vm1, %v347_v59, 0.0 }
 0x29f   :  { %v354_v53 = vadd.f32 %v352_v60, %v339_v49  ;;  %v355_v11 = vadd.f32 %v353_v61, %v340_v50 }
 0x2a1   :  { %v358_v20 = vcombine.low %v354_v53, %v355_v11 }
 0x2a3   :  { %v365_v21 = vrot.slane %v358_v20, %v364_v52 }
 0x2a5   :  { %v372_v12 = vrot.slane %v365_v21, %v364_v52 }
 0x2a7   :  { %378 = vst.msk [vmem:[#allocation5] sm:$0x3] %vm376_vm2, %v372_v12 }
 0x2a8   :  { %441 = shalt.err (!%p438_p12)
}
 0x2a9   :  { %s442_s26 = scalar_lea.hbm %s809_s1, 32 }
 0x2aa   :  { %p443_p13 = scmp.ne.s32.totalorder %s809_s1, %s442_s26  ;;  %p446_p0 = scmp.lt.u32.totalorder %s442_s26, %s809_s1 }
 0x2ac   :  { %p448_p1 = pnand %p446_p0, %p443_p13 }
 0x2ae   :  { %451 = shalt.err (!%p448_p1)
}
 0x2af   :  { %388 = dma.vmem_to_hbm [thread:$0]  %s386_s22, 32, %s809_s1, [#allocation4]  }
 0x2b0   :  { %454 = dma.done.wait [#allocation4], 32  }
 0x2b1   :  { %455 = vsyncadd [#allocation4], 4294967264 }
 0x2b2   :  { %392 = vsyncpa [#allocation3], 1 }
 0x2b3   :  { %393 = vsyncpa [#allocation4], 1 }

</bundles_post_ra>
